<compile_context>
chip_gen: v7x
topology: tpu7x:2x2x1
jax: 0.10.0
libtpu: 0.0.40
codegen_flags: <defaults>
</compile_context>

<pallas_src>
import jax
import jax.numpy as jnp
from jax.experimental import pallas as pl
from jax.experimental.pallas import tpu as pltpu

_LANES = 128
_SUBLANE_TILE = 2048  # rows per block: 2048 * 128 * 4B = 1 MiB per f32 buffer


def _glu_kernel(a_ref, b_ref, o_ref):
    # a_ref: value half, b_ref: gate half; both blocks have identical shape.
    a = a_ref[...].astype(jnp.float32)
    b = b_ref[...].astype(jnp.float32)
    o_ref[...] = (a * jax.nn.sigmoid(b)).astype(o_ref.dtype)


def glu(x):
    """GLU over the channel axis of an NCHW tensor."""
    N, C, H, W = x.shape
    assert C % 2 == 0, "channels can't divide by 2!"
    nc = C // 2
    hw = H * W
    m = nc * hw  # elements per half per batch (each half is contiguous)

    cparams = pltpu.CompilerParams(
        dimension_semantics=("parallel", "parallel"),
        vmem_limit_bytes=32 * 1024 * 1024,
    )

    if m % _LANES == 0:
        # Lane-dense slab path: each half per batch is a contiguous (R, 128) slab.
        r = m // _LANES
        t_s = r if r <= _SUBLANE_TILE else _SUBLANE_TILE
        x4 = x.reshape(N, 2, r, _LANES)  # pure metadata reshape; [:,0]=value, [:,1]=gate
        out = pl.pallas_call(
            _glu_kernel,
            out_shape=jax.ShapeDtypeStruct((N, r, _LANES), x.dtype),
            grid_spec=pltpu.PrefetchScalarGridSpec(
                num_scalar_prefetch=0,
                grid=(N, pl.cdiv(r, t_s)),
                in_specs=[
                    pl.BlockSpec((None, None, t_s, _LANES), lambda n, s: (n, 0, s, 0)),
                    pl.BlockSpec((None, None, t_s, _LANES), lambda n, s: (n, 1, s, 0)),
                ],
                out_specs=pl.BlockSpec((None, t_s, _LANES), lambda n, s: (n, s, 0)),
            ),
            compiler_params=cparams,
        )(x4, x4)
        return out.reshape(N, nc, H, W)

    # Fallback (nc*H*W not a multiple of 128): keep the (nc, hw) layout with
    # full-extent blocks (correct via the full-dim exception; stores may be masked).
    x4 = x.reshape(N, 2, nc, hw)
    out = pl.pallas_call(
        _glu_kernel,
        out_shape=jax.ShapeDtypeStruct((N, nc, hw), x.dtype),
        grid_spec=pltpu.PrefetchScalarGridSpec(
            num_scalar_prefetch=0,
            grid=(N, 1),
            in_specs=[
                pl.BlockSpec((None, None, nc, hw), lambda n, s: (n, 0, 0, 0)),
                pl.BlockSpec((None, None, nc, hw), lambda n, s: (n, 1, 0, 0)),
            ],
            out_specs=pl.BlockSpec((None, nc, hw), lambda n, s: (n, 0, 0)),
        ),
        compiler_params=cparams,
    )(x4, x4)
    return out.reshape(N, nc, H, W)


if __name__ == "__main__":
    key = jax.random.PRNGKey(0)
    x = jax.random.normal(key, (2, 4, 16, 16), dtype=jnp.float32)  # NCHW

    y = glu(x)
    jax.block_until_ready(y)

    nc = x.shape[1] // 2
    y_ref = x[:, :nc] * jax.nn.sigmoid(x[:, nc:])
    assert y.shape == (2, 2, 16, 16)
    assert jnp.allclose(y, y_ref, atol=1e-6), "mismatch vs reference (f32)"

    # bf16 I/O stays bf16 end-to-end; math runs in f32 inside the kernel.
    xb = x.astype(jnp.bfloat16)
    yb = glu(xb)
    jax.block_until_ready(yb)
    yb_ref = (xb[:, :nc].astype(jnp.float32)
              * jax.nn.sigmoid(xb[:, nc:].astype(jnp.float32))).astype(jnp.bfloat16)
    assert yb.dtype == jnp.bfloat16
    assert jnp.allclose(yb.astype(jnp.float32), yb_ref.astype(jnp.float32),
                        atol=2e-2, rtol=2e-2), "mismatch vs reference (bf16)"

    # Odd spatial/channel size exercises the non-128-multiple fallback path.
    x_odd = jax.random.normal(jax.random.PRNGKey(1), (2, 6, 5, 5), dtype=jnp.float32)
    y_odd = glu(x_odd)
    jax.block_until_ready(y_odd)
    y_odd_ref = x_odd[:, :3] * jax.nn.sigmoid(x_odd[:, 3:])
    assert jnp.allclose(y_odd, y_odd_ref, atol=1e-6), "mismatch vs reference (fallback)"

    print("KERNEL_OK")
</pallas_src>

<mosaic_0001>
module attributes {stable_mosaic.version = 11 : i64} {
  func.func @_glu_kernel(%arg0: i32, %arg1: i32, %arg2: memref<1x1x4x128xf32, #tpu.memory_space<vmem>>, %arg3: memref<1x1x4x128xf32, #tpu.memory_space<vmem>>, %arg4: memref<1x4x128xf32, #tpu.memory_space<vmem>>) attributes {dimension_semantics = [#tpu.dimension_semantics<parallel>, #tpu.dimension_semantics<parallel>], iteration_bounds = array<i64: 2, 1>, scalar_prefetch = 0 : i64, scratch_operands = 0 : i64, tpu.core_type = #tpu.core_type<tc>, window_params = [{transform_indices = @transform_0, window_bounds = array<i64: 1, 1, 4, 128>}, {transform_indices = @transform_1, window_bounds = array<i64: 1, 1, 4, 128>}, {transform_indices = @transform_2, window_bounds = array<i64: 1, 4, 128>}]} {
    %c0 = arith.constant 0 : index
    %c0_0 = arith.constant 0 : index
    %c0_1 = arith.constant 0 : index
    %c0_2 = arith.constant 0 : index
    %0 = vector.load %arg2[%c0, %c0_0, %c0_1, %c0_2] : memref<1x1x4x128xf32, #tpu.memory_space<vmem>>, vector<1x1x4x128xf32>
    %1 = vector.shape_cast %0 : vector<1x1x4x128xf32> to vector<4x128xf32>
    %c0_3 = arith.constant 0 : index
    %c0_4 = arith.constant 0 : index
    %c0_5 = arith.constant 0 : index
    %c0_6 = arith.constant 0 : index
    %2 = vector.load %arg3[%c0_3, %c0_4, %c0_5, %c0_6] : memref<1x1x4x128xf32, #tpu.memory_space<vmem>>, vector<1x1x4x128xf32>
    %3 = vector.shape_cast %2 : vector<1x1x4x128xf32> to vector<4x128xf32>
    %4 = arith.negf %3 : vector<4x128xf32>
    %5 = math.exp %4 : vector<4x128xf32>
    %cst = arith.constant 1.000000e+00 : f32
    %6 = vector.broadcast %cst : f32 to vector<4x128xf32>
    %7 = arith.addf %6, %5 : vector<4x128xf32>
    %8 = arith.divf %6, %7 : vector<4x128xf32>
    %9 = arith.mulf %1, %8 : vector<4x128xf32>
    %c0_7 = arith.constant 0 : index
    %c0_8 = arith.constant 0 : index
    %c0_9 = arith.constant 0 : index
    %10 = vector.load %arg4[%c0_7, %c0_8, %c0_9] : memref<1x4x128xf32, #tpu.memory_space<vmem>>, vector<1x4x128xf32>
    %11 = vector.shape_cast %10 : vector<1x4x128xf32> to vector<4x128xf32>
    %12 = vector.shape_cast %9 : vector<4x128xf32> to vector<1x4x128xf32>
    tpu.vector_store %arg4[%c0_7, %c0_8, %c0_9], %12 {strides = array<i32>} : memref<1x4x128xf32, #tpu.memory_space<vmem>>, vector<1x4x128xf32>,
    return
  }
  func.func @transform_0(%arg0: i32, %arg1: i32) -> (i32, i32, i32, i32) {
    %c0_i32 = arith.constant 0 : i32
    %c0_i32_0 = arith.constant 0 : i32
    %c0_i32_1 = arith.constant 0 : i32
    return %arg0, %c0_i32, %arg1, %c0_i32_0 : i32, i32, i32, i32
  }
  func.func @transform_1(%arg0: i32, %arg1: i32) -> (i32, i32, i32, i32) {
    %c1_i32 = arith.constant 1 : i32
    %c0_i32 = arith.constant 0 : i32
    %c0_i32_0 = arith.constant 0 : i32
    return %arg0, %c1_i32, %arg1, %c0_i32 : i32, i32, i32, i32
  }
  func.func @transform_2(%arg0: i32, %arg1: i32) -> (i32, i32, i32) {
    %c0_i32 = arith.constant 0 : i32
    %c0_i32_0 = arith.constant 0 : i32
    return %arg0, %arg1, %c0_i32 : i32, i32, i32
  }
}

</mosaic_0001>

<bundles_post_ra>
// kernel: tpu_custom_call.1
= control target key start
LH: loop header
LB: loop body
LE: loop exit
PB: predicated region body
PF: predicated region fallthrough
CT: control target
= control target key end

     0   :  { %7 = vsyncpa [#allocation3], 0  ;;  %s829_s0 = inlined_call_operand.hbm [shape: f32[2,2,4,128], index: 0, kind: input, shape index: {}]   ;;  %s830_s1 = inlined_call_operand.hbm [shape: f32[2,2,4,128], index: 1, kind: input, shape index: {}]   ;;  %s831_s2 = inlined_call_operand.hbm [shape: f32[2,4,128], index: 2, kind: output, shape index: {}]  }
   0x1   :  { %9 = vsyncpa [#allocation3 + $0x1], 0 }
   0x2   :  { %10 = vsyncpa [#allocation6], 0 }
   0x3   :  { %12 = vsyncpa [#allocation6 + $0x1], 0 }
   0x4   :  { %13 = vsyncpa [#allocation4], 0 }
   0x5   :  { %15 = vsyncpa [#allocation4 + $0x1], 0  ;;  %s610_s9 = smov 0   ;;  %s612_s10 = smov 0  }
   0x6   :  { %s614_s11 = smov 0   ;;  %s616_s12 = smov 0  }
   0x7   :  { %s618_s13 = smov 0   ;;  %s620_s14 = smov 0  }
   0x8 LB: > { %s351_s15 = sadd.s32 4294967295, %s590_s14   ;;  %s352_s16 = sadd.s32 4294967294, %s590_s14   ;;  %s590_s14 = sphi %s620_s14, %s21_s14   ;;  %s586_s13 = sphi %s618_s13, %s851_s13   ;;  %s582_s12 = sphi %s616_s12, %s850_s12   ;;  %s578_s11 = sphi %s614_s11, %s849_s11   ;;  %s574_s10 = sphi %s612_s10, %s848_s10   ;;  %s570_s9 = sphi %s610_s9, %s847_s9  }
   0x9   : > { %s33_s17 = sadd.s32 1, %s586_s13  ;;  %s42_s18 = sadd.s32 1, %s578_s11 }
   0xa   : > { %p35_p0 = scmp.ge.s32.totalorder %s33_s17, 2  ;;  %p49_p1 = scmp.ne.s32.totalorder %s578_s11, %s574_s10 }
   0xb   : > { %p50_p2 = scmp.eq.s32.totalorder %s590_s14, 0  ;;  %p55_p3 = scmp.ne.s32.totalorder %s574_s10, %s570_s9 }
   0xc   : > { %s853_s17 = smov (%p35_p0, %s33_s17), 0  ;;  %p56_p5 = scmp.eq.s32.totalorder %s351_s15, 0 }
   0xd   : > { %p651_p4 = por %p50_p2, %p49_p1  ;;  %s37_s20 = ssub.s32 %s586_s13, %s853_s17 }
   0xe   : > { %p109_p6 = scmp.eq.s32.totalorder %s351_s15, 1  ;;  %p40_p7 = scmp.eq.s32.totalorder %s37_s20, 0 }
   0xf   : > { %p657_p8 = por %p56_p5, %p55_p3  ;;  %p115_p10 = scmp.eq.s32.totalorder %s352_s16, 1 }
  0x10   : > { %p661_p9 = por %p109_p6, %p49_p1  ;;  %p389_p13 = scmp.lt.s32.totalorder %s590_s14, 2 }
  0x11   : > { %s835_s21 = scalar_select %p657_p8, 1, 0 }
  0x12   : > { %s836_s22 = scalar_select %p661_p9, 1, 0 }
  0x13   : > { %s666_s23 = scalar_select %p40_p7, %s578_s11, %s42_s18  }
  0x14   : > { %p668_p11 = por %p115_p10, %p55_p3  ;;  %s675_s25 = sand.u32 1, %s578_s11  }
  0x15   : > { %s355_s26 = sshll.u32 %s675_s25, 2  ;;  %s370_s27 = sshll.u32 %s586_s13, 7 }
  0x16   : > { %s837_s24 = scalar_select %p668_p11, 1, 0 }
  0x17   : > { %s684_s30 = scalar_lea.hbm %s829_s0, %s370_s27  ;;  %s139_s3 = scalar_lea.vmem [#allocation2], %s355_s26 }
  0x18   : > { %s148_s4 = sshll.u32 %s139_s3, 4  ;;  %p692_p0 = pnand %p389_p13, %p651_p4  ;;  %s688_s4 = int_to_ptr.vmem [resolvable:$true] %s148_s4 }
  0x19   : > { %s136_s6 = scalar_lea.sflag [#allocation3], %s675_s25  ;;  %s443_s7 = scalar_lea.hbm %s684_s30, 64 }
  0x1a   : > { %p444_p3 = scmp.ne.s32.totalorder %s684_s30, %s443_s7  ;;  %p445_p5 = pneg %p692_p0 }
  0x1b   : > { %s448_s16 = scalar_lea.hbm %s829_s0, 256  ;;  %p449_p4 = scmp.lt.u32.totalorder %s684_s30, %s829_s0 }
  0x1c   : > { %p446_p6 = pnand %p445_p5, %p444_p3  ;;  %p450_p10 = scmp.lt.u32.totalorder %s448_s16, %s443_s7 }
  0x1d   : > { %p452_p12 = scmp.lt.u32.totalorder %s443_s7, %s684_s30 }
  0x1e   : > { %p447_p7 = pneg %p446_p6  ;;  %p451_p13 = por %p450_p10, %p449_p4 }
  0x20   : > { %p453_p1 = por %p452_p12, %p451_p13 }
  0x22   : > { %p454_p2 = pnand %p453_p1, %p447_p7 }
  0x24   : > { %457 = shalt.err (!%p454_p2)
}
  0x25   : > { %s458_s20 = scalar_lea.vmem %s688_s4, 64  ;;  %s592_s28 = smov [#allocation2]  }
  0x26   : > { %p459_p3 = scmp.ne.s32.totalorder %s688_s4, %s458_s20  ;;  %s463_s29 = sshll.u32 %s592_s28, 4  ;;  %s464_s29 = int_to_ptr.vmem [resolvable:$false] %s463_s29 }
  0x27   : > { %s465_s3 = scalar_lea.vmem %s464_s29, 128  ;;  %p466_p9 = scmp.lt.s32.totalorder %s688_s4, %s464_s29 }
  0x28   : > { %p461_p6 = pnand %p459_p3, %p445_p5  ;;  %p467_p4 = scmp.lt.s32.totalorder %s465_s3, %s458_s20 }
  0x2a   : > { %p462_p11 = pneg %p461_p6  ;;  %p468_p10 = por %p467_p4, %p466_p9 }
  0x2c   : > { %p469_p12 = pnand %p468_p10, %p462_p11 }
  0x2e   : > { %472 = shalt.err (!%p469_p12)
}
  0x2f   : > { %381 = dma.hbm_to_vmem [thread:$0]  (!%p692_p0), %s684_s30, 64, %s688_s4, %s136_s6  }
  0x30   : > { %p839_p1 = scmp.lt.s32.totalorder %s590_s14, 3  ;;  %p840_p2 = scmp.ge.s32.totalorder %s590_s14, 1 }
  0x31   : > { %s284_s16 = scalar_lea.hbm %s830_s1, %s370_s27  ;;  %s159_s18 = scalar_lea.vmem [#allocation5], %s355_s26 }
  0x32   : > { %p728_p7 = pnand %p840_p2, %p839_p1  ;;  %s169_s19 = sshll.u32 %s159_s18, 4  ;;  %s170_s19 = int_to_ptr.vmem [resolvable:$true] %s169_s19 }
  0x33   : > { %s739_s20 = scalar_lea.hbm %s284_s16, 64  ;;  %s156_s30 = scalar_lea.sflag [#allocation6], %s675_s25 }
  0x34   : > { %s841_s7 = scalar_select %p728_p7, 1, 0 }
  0x35   : > { %s503_s4 = scalar_lea.hbm %s284_s16, 128  ;;  %s478_s27 = scalar_lea.hbm %s830_s1, 256 }
  0x36   : > { %p474_p9 = scmp.ne.s32.totalorder %s739_s20, %s503_s4  ;;  %p479_p3 = scmp.lt.u32.totalorder %s739_s20, %s830_s1 }
  0x37   : > { %p480_p6 = scmp.lt.u32.totalorder %s478_s27, %s503_s4  ;;  %p482_p10 = scmp.lt.u32.totalorder %s503_s4, %s739_s20 }
  0x38   : > { %p476_p11 = pnand %p474_p9, %p445_p5 }
  0x39   : > { %p481_p4 = por %p480_p6, %p479_p3 }
  0x3a   : > { %p477_p13 = pneg %p476_p11 }
  0x3b   : > { %p483_p12 = por %p482_p10, %p481_p4 }
  0x3d   : > { %p484_p1 = pnand %p483_p12, %p477_p13 }
  0x3f   : > { %487 = shalt.err (!%p484_p1)
}
  0x40   : > { %s488_s25 = scalar_lea.vmem %s170_s19, 64  ;;  %s593_s3 = smov [#allocation5]  }
  0x41   : > { %p489_p2 = scmp.ne.s32.totalorder %s170_s19, %s488_s25  ;;  %s493_s8 = sshll.u32 %s593_s3, 4  ;;  %s494_s8 = int_to_ptr.vmem [resolvable:$false] %s493_s8 }
  0x42   : > { %s495_s15 = scalar_lea.vmem %s494_s8, 128  ;;  %p496_p8 = scmp.lt.s32.totalorder %s170_s19, %s494_s8 }
  0x43   : > { %p491_p9 = pnand %p489_p2, %p445_p5  ;;  %p497_p7 = scmp.lt.s32.totalorder %s495_s15, %s488_s25 }
  0x45   : > { %p492_p11 = pneg %p491_p9  ;;  %p498_p3 = por %p497_p7, %p496_p8 }
  0x47   : > { %p499_p6 = pnand %p498_p3, %p492_p11 }
  0x49   : > { %502 = shalt.err (!%p499_p6)
}
  0x4a   : > { %384 = dma.hbm_to_vmem [thread:$0]  (!%p692_p0), %s739_s20, 64, %s170_s19, %s156_s30  }
  0x4b   : > { %p842_p13 = scmp.ne.s32.totalorder %s841_s7, 0 }
  0x4c   : > { %s763_s16 = sand.u32 (!%p842_p13), 1, %s574_s10   ;;  %p843_p5 = scmp.ne.s32.totalorder (!%p842_p13), %s835_s21, 0 }
  0x4d   : > { %178 = sbr.rel (%p842_p13) target bundleno = 130 (0x82), region = 28  ;;  %s362_s18 = sshll.u32 (!%p842_p13), %s763_s16, 2 }
  0x4e   : > { %s181_s4 = scalar_lea.sflag (!%p842_p13), [#allocation3], %s763_s16  ;;  %s184_s6 = scalar_lea.vmem (!%p842_p13), [#allocation2], %s362_s18 }
  0x54   : > { %557 = dma.done.wait (%p843_p5), %s181_s4, 64  }
  0x55   : > { %559 = vsyncadd (%p843_p5), %s181_s4, 4294967232  ;;  %s190_s5 = scalar_lea.sflag [#allocation6], %s763_s16  ;;  %s193_s19 = scalar_lea.vmem [#allocation5], %s362_s18 }
  0x56   : > { %561 = dma.done.wait (%p843_p5), %s190_s5, 64  }
  0x57   : > { %563 = vsyncadd (%p843_p5), %s190_s5, 4294967232  ;;  %v220_v0 = vld [vmem:[%s193_s19] sm:$0xf]  ;;  %v219_v4 = vld [vmem:[%s184_s6] sm:$0xf]  ;;  %s218_s7 = scalar_lea.vmem [#allocation7], %s362_s18 }
  0x58   : > { %v365_v1 = vmul.f32 -1.442695, %v220_v0  ;;  %s244_s20 = sshll.u32 %s218_s7, 4  ;;  %s367_s30 = sshll.u32 %s582_s12, 6  ;;  %s777_s20 = int_to_ptr.vmem [resolvable:$true] %s244_s20 }
  0x59   : > { %s782_s27 = scalar_lea.hbm %s831_s2, %s367_s30  ;;  %s230_s29 = scalar_lea.sflag [#allocation4], %s763_s16 }
  0x5a   : > { %439 = vpow2.f32 %v365_v1  ;;  %s504_s26 = scalar_lea.vmem %s777_s20, 64  ;;  %p844_p0 = scmp.ne.s32.totalorder %s836_s22, 0 }
  0x5b   : > { %p505_p8 = scmp.ne.s32.totalorder %s777_s20, %s504_s26  ;;  %s594_s12 = smov [#allocation7]  }
  0x5c   : > { %s508_s25 = sshll.u32 %s594_s12, 4  ;;  %s509_s25 = int_to_ptr.vmem [resolvable:$false] %s508_s25 }
  0x5d   : > { %p506_p7 = pnand %p505_p8, %p844_p0  ;;  %s510_s3 = scalar_lea.vmem %s509_s25, 128 }
  0x5e   : > { %p511_p10 = scmp.lt.s32.totalorder %s777_s20, %s509_s25  ;;  %p512_p12 = scmp.lt.s32.totalorder %s510_s3, %s504_s26 }
  0x5f   : > { %p507_p4 = pneg %p506_p7 }
  0x60   : > { %p513_p1 = por %p512_p12, %p511_p10 }
  0x62   : > { %p514_p2 = pnand %p513_p1, %p507_p4 }
  0x64   : > { %v440_v2 = vpop.eup %439 }
  0x65   : > { %v224_v3 = vadd.f32 1.0, %v440_v2 }
  0x67   : > { %441 = vrcp.f32 %v224_v3 }
  0x71   : > { %v442_v5 = vpop.eup %441 }
  0x72   : > { %v227_v6 = vmul.f32 %v442_v5, %v219_v4 }
  0x74   : > { %228 = vst [vmem:[%s218_s7] sm:$0xf] %v227_v6 }
  0x75   : > { %517 = shalt.err (!%p514_p2)
}
  0x76   : > { %s518_s8 = scalar_lea.hbm %s782_s27, 64  ;;  %s522_s18 = scalar_lea.hbm %s831_s2, 128 }
  0x77   : > { %p519_p9 = scmp.ne.s32.totalorder %s782_s27, %s518_s8  ;;  %p523_p6 = scmp.lt.u32.totalorder %s782_s27, %s831_s2 }
  0x78   : > { %p524_p13 = scmp.lt.u32.totalorder %s522_s18, %s518_s8  ;;  %p526_p8 = scmp.lt.u32.totalorder %s518_s8, %s782_s27 }
  0x79   : > { %p520_p11 = pnand %p519_p9, %p844_p0 }
  0x7a   : > { %p525_p5 = por %p524_p13, %p523_p6 }
  0x7b   : > { %p521_p3 = pneg %p520_p11 }
  0x7c   : > { %p527_p7 = por %p526_p8, %p525_p5 }
  0x7e   : > { %p528_p4 = pnand %p527_p7, %p521_p3 }
  0x80   : > { %531 = shalt.err (!%p528_p4)
}
  0x81   : > { %376 = dma.vmem_to_hbm [thread:$0]  (%p844_p0), %s777_s20, 64, %s782_s27, %s230_s29  }
  0x82 PF: > { %s256_s5 = sand.u32 1, %s570_s9   ;;  %p845_p10 = scmp.ne.s32.totalorder %s837_s24, 0 }
  0x83   : > { %p846_p12 = scmp.ge.s32.totalorder %s590_s14, 2  ;;  %s257_s19 = scalar_lea.sflag [#allocation4], %s256_s5 }
  0x85   : > { %p386_p1 = pnand %p846_p12, %p845_p10 }
  0x87   : > { %565 = dma.done.wait (!%p386_p1), %s257_s19, 64  }
  0x88   : > { %567 = vsyncadd (!%p386_p1), %s257_s19, 4294967232  ;;  %s21_s14 = sadd.s32 1, %s590_s14   ;;  %s847_s9 = smov %s574_s10 }
  0x89   : > { %p18_p2 = scmp.ge.s32.totalorder %s21_s14, 4   ;;  %s848_s10 = smov %s578_s11 }
  0x8a   : > { %s849_s11 = smov %s666_s23  ;;  %s850_s12 = smov %s586_s13 }
  0x8b   : > { %s851_s13 = smov %s853_s17  ;;  %20 = sbr.rel (!%p18_p2) target bundleno = 8 (0x8), region = 86 }
  0x92   :  { %262 = vsyncpa [#allocation3], 1 }
  0x93   :  { %264 = vsyncpa [#allocation3 + $0x1], 1 }
  0x94   :  { %265 = vsyncpa [#allocation6], 1 }
  0x95   :  { %267 = vsyncpa [#allocation6 + $0x1], 1 }
  0x96   :  { %268 = vsyncpa [#allocation4], 1 }
  0x97   :  { %270 = vsyncpa [#allocation4 + $0x1], 1 }

</bundles_post_ra>
